<compile_context>
chip_gen: v6e
topology: v6e:2x2x1
jax: 0.10.0
libtpu: 0.0.40
codegen_flags: <defaults>
</compile_context>

<pallas_src>
import jax
import jax.numpy as jnp
from jax.experimental import pallas as pl
from jax.experimental.pallas import tpu as pltpu

POWER = 2  # Normalize(power=2); the rsqrt fast path below assumes power == 2.


def _normalize_kernel(x_ref, o_ref):
    # x_ref / o_ref: (TB, D) VMEM tiles. Rows are independent, so garbage rows
    # in the ragged last block are harmless (their stores are masked).
    x = x_ref[...]
    xf = x if x.dtype == jnp.float32 else x.astype(jnp.float32)
    ssum = jnp.sum(xf * xf, axis=-1, keepdims=True)   # (TB, 1)
    inv = jax.lax.rsqrt(ssum)                          # single EUP op
    o_ref[...] = (xf * inv).astype(o_ref.dtype)


def _round_down(n, m):
    return (n // m) * m


def _vmem_capacity_bytes():
    try:
        return int(pltpu.get_tpu_info().vmem_capacity_bytes)
    except Exception:
        return 64 * 1024 * 1024  # conservative fallback (v7x per-TC VMEM)


def _default_tile_budget_bytes(vmem_cap):
    # v7x: 64 MiB/TC but 3.2 TB/s HBM -> bigger tiles amortize the ~0.35 us
    # per-grid-step overhead. v5e/v6e (128 MiB physical) are already near the
    # HBM roofline at a few MiB per tile.
    if vmem_cap <= 64 * 1024 * 1024:
        return 6 * 1024 * 1024
    return 4 * 1024 * 1024


def normalize(x, *, tile_rows=None, vmem_tile_budget_bytes=None):
    """L2-normalize each row of x (B, D); matches Normalize().forward(x, dim=1)."""
    B, D = x.shape
    itemsize = jnp.dtype(x.dtype).itemsize
    # Sublane alignment for the row tile (f32: 8, bf16: 16, int8/fp8: 32).
    row_align = {4: 8, 2: 16, 1: 32}.get(itemsize, 8)

    vmem_cap = _vmem_capacity_bytes()
    if vmem_tile_budget_bytes is None:
        vmem_tile_budget_bytes = _default_tile_budget_bytes(vmem_cap)

    if tile_rows is None:
        # Per-row bytes: in + out tiles at input width plus ~2 f32-wide
        # intermediates when the kernel upcasts sub-32-bit inputs.
        f32_overhead = 0 if itemsize >= 4 else 2 * 4
        per_row_bytes = D * (2 * itemsize + f32_overhead)
        tile_rows = max(row_align, vmem_tile_budget_bytes // max(1, per_row_bytes))
    tile_rows = max(row_align, _round_down(int(tile_rows), row_align))

    if B <= row_align:
        # Block first dim equals the full array dim -> always legal.
        tile_rows = B
    else:
        tile_rows = min(tile_rows, max(row_align, _round_down(B, row_align)))
        # >= 4 grid steps when B allows: >= 2 steps per TensorCore after v7x
        # megacore sharding of the "parallel" axis keeps DMA double-buffered.
        min_steps = 4
        if pl.cdiv(B, tile_rows) < min_steps and B >= min_steps * row_align:
            tile_rows = max(row_align, _round_down(B // min_steps, row_align))

    grid = (pl.cdiv(B, tile_rows),)

    # Explicit VMEM limit: double-buffered in + out tiles, f32 temps, headroom.
    # Clears v5e's 16 MiB scoped default, stays under the chip's physical VMEM.
    tile_io_bytes = tile_rows * D * itemsize
    tile_f32_bytes = tile_rows * D * 4
    vmem_needed = 4 * tile_io_bytes + 2 * tile_f32_bytes + (2 << 20)
    vmem_limit = int(min(max(vmem_needed, 24 << 20), (vmem_cap * 3) // 4))
    # TODO(synk): if D is so large that even tile_rows == row_align overflows
    # the limit, switch to a two-pass (sum-of-squares then scale) kernel that
    # chunks D into lane blocks.
    # TODO(synk): for best store throughput arrange D as a multiple of 128
    # lanes at the model boundary (zero-padding D never changes the L2 norm);
    # odd D still runs correctly here via masked partial stores.
    # TODO(synk): if this op follows a matmul/attention kernel in a real model,
    # fuse the normalization into that kernel's epilogue to skip the 2*B*D HBM
    # round-trip entirely.

    cost = pl.CostEstimate(
        flops=3 * B * D,                      # square + reduce-add + scale
        transcendentals=B,                    # one rsqrt per row
        bytes_accessed=2 * B * D * itemsize,  # read x + write out
    )

    return pl.pallas_call(
        _normalize_kernel,
        out_shape=jax.ShapeDtypeStruct((B, D), x.dtype),
        grid_spec=pltpu.PrefetchScalarGridSpec(
            num_scalar_prefetch=0,
            grid=grid,
            in_specs=[pl.BlockSpec((tile_rows, D), lambda i: (i, 0))],
            out_specs=pl.BlockSpec((tile_rows, D), lambda i: (i, 0)),
        ),
        compiler_params=pltpu.CompilerParams(
            dimension_semantics=("parallel",),
            vmem_limit_bytes=vmem_limit,
        ),
        cost_estimate=cost,
    )(x)


def _reference(x):
    # Mirrors the PyTorch forward exactly (no eps clamp), in f32.
    xf = x.astype(jnp.float32)
    norm = jnp.power(jnp.sum(jnp.power(xf, POWER), axis=1, keepdims=True), 1.0 / POWER)
    return xf / norm


if __name__ == "__main__":
    key = jax.random.PRNGKey(0)

    # Case 1: aligned batch, lane-dense D.
    x1 = jax.random.normal(key, (16, 128), dtype=jnp.float32)
    out1 = jax.block_until_ready(normalize(x1))
    assert out1.shape == (16, 128)
    assert jnp.allclose(out1, _reference(x1), atol=1e-5, rtol=1e-5), "mismatch (case 1)"

    # Case 2: ragged batch + non-128 D (exercises the masked last block; no
    # wrapper pad/slice anymore).
    x2 = jax.random.normal(jax.random.PRNGKey(1), (10, 96), dtype=jnp.float32)
    out2 = jax.block_until_ready(normalize(x2))
    assert out2.shape == (10, 96)
    assert jnp.allclose(out2, _reference(x2), atol=1e-5, rtol=1e-5), "mismatch (case 2)"

    # Case 3: bf16 input (exercises the f32-upcast path and multi-step grid).
    x3 = jax.random.normal(jax.random.PRNGKey(2), (64, 256), dtype=jnp.bfloat16)
    out3 = jax.block_until_ready(normalize(x3))
    assert out3.shape == (64, 256) and out3.dtype == jnp.bfloat16
    assert jnp.allclose(out3.astype(jnp.float32), _reference(x3), atol=2e-2, rtol=2e-2), \
        "mismatch (case 3)"

    print("KERNEL_OK")
</pallas_src>

<mosaic_0001>
module attributes {stable_mosaic.version = 11 : i64} {
  func.func @_normalize_kernel(%arg0: i32, %arg1: memref<16x128xf32, #tpu.memory_space<vmem>>, %arg2: memref<16x128xf32, #tpu.memory_space<vmem>>) attributes {dimension_semantics = [#tpu.dimension_semantics<parallel>], iteration_bounds = array<i64: 1>, scalar_prefetch = 0 : i64, scratch_operands = 0 : i64, tpu.core_type = #tpu.core_type<tc>, window_params = [{transform_indices = @transform_0, window_bounds = array<i64: 16, 128>}, {transform_indices = @transform_1, window_bounds = array<i64: 16, 128>}]} {
    %c0 = arith.constant 0 : index
    %c0_0 = arith.constant 0 : index
    %0 = vector.load %arg1[%c0, %c0_0] : memref<16x128xf32, #tpu.memory_space<vmem>>, vector<16x128xf32>
    %1 = arith.mulf %0, %0 : vector<16x128xf32>
    %cst = arith.constant dense<0.000000e+00> : vector<16xf32>
    %2 = vector.multi_reduction <add>, %1, %cst [1] : vector<16x128xf32> to vector<16xf32>
    %3 = vector.shape_cast %2 : vector<16xf32> to vector<16x1xf32>
    %4 = math.rsqrt %3 : vector<16x1xf32>
    %5 = vector.broadcast %4 : vector<16x1xf32> to vector<16x128xf32>
    %6 = arith.mulf %0, %5 : vector<16x128xf32>
    %c0_1 = arith.constant 0 : index
    %c0_2 = arith.constant 0 : index
    %7 = vector.load %arg2[%c0_1, %c0_2] : memref<16x128xf32, #tpu.memory_space<vmem>>, vector<16x128xf32>
    tpu.vector_store %arg2[%c0_1, %c0_2], %6 {strides = array<i32>} : memref<16x128xf32, #tpu.memory_space<vmem>>, vector<16x128xf32>,
    return
  }
  func.func @transform_0(%arg0: i32) -> (i32, i32) {
    %c0_i32 = arith.constant 0 : i32
    %c0_i32_0 = arith.constant 0 : i32
    return %arg0, %c0_i32 : i32, i32
  }
  func.func @transform_1(%arg0: i32) -> (i32, i32) {
    %c0_i32 = arith.constant 0 : i32
    %c0_i32_0 = arith.constant 0 : i32
    return %arg0, %c0_i32 : i32, i32
  }
}

</mosaic_0001>

<bundles_post_ra>
// kernel: tpu_custom_call.1
= control target key start
LH: loop header
LB: loop body
LE: loop exit
PB: predicated region body
PF: predicated region fallthrough
CT: control target
= control target key end

     0   :  { %6 = vsyncpa [#allocation3], 0  ;;  %s132_s0 = inlined_call_operand.hbm [shape: f32[16,128], index: 0, kind: input, shape index: {}]   ;;  %s133_s1 = inlined_call_operand.hbm [shape: f32[16,128], index: 1, kind: output, shape index: {}]  }
   0x1   :  { %7 = vsyncpa [#allocation4], 0  ;;  %s106_s6 = smov [#allocation2]  }
   0x2   :  { %s13_s7 = sshll.u32 %s106_s6, 4  ;;  %s14_s7 = int_to_ptr.vmem [resolvable:$true] %s13_s7 }
   0x3   :  { %s70_s8 = scalar_lea.vmem %s14_s7, 256  ;;  %p75_p1 = scmp.lt.s32.totalorder %s14_s7, %s14_s7 }
   0x4   :  { %p71_p0 = scmp.ne.s32.totalorder %s14_s7, %s70_s8  ;;  %p76_p2 = scmp.lt.s32.totalorder %s70_s8, %s70_s8 }
   0x6   :  { %p77_p3 = por %p76_p2, %p75_p1 }
   0x8   :  { %p78_p4 = pnand %p77_p3, %p71_p0 }
   0xa   :  { %81 = shalt.err (!%p78_p4)
}
   0xb   :  { %s107_s9 = smov 128   ;;  %s108_s10 = smov 8  }
   0xc   :  { %19 = dma.hbm_to_vmem [thread:$0]  %s132_s0, 256, %s14_s7, [#allocation3], %s107_s9, %s107_s9, %s108_s10  }
   0xd   :  { %102 = dma.done.wait [#allocation3], 256  }
   0xe   :  { %103 = vsyncadd [#allocation3], 4294967040  ;;  %v23_v0 = vld [vmem:[#allocation2] sm:$0xff]  ;;  %v24_v1 = vld [vmem:[#allocation2 + $0x8] sm:$0xff]  ;;  %s109_s13 = smov [#allocation5]  }
   0xf   :  { %v25_v2 = vmul.f32 %v23_v0, %v23_v0  ;;  %v26_v3 = vmul.f32 %v24_v1, %v24_v1  ;;  %s42_s14 = sshll.u32 %s109_s13, 4  ;;  %s43_s14 = int_to_ptr.vmem [resolvable:$true] %s42_s14 }
  0x10   :  { %s82_s0 = scalar_lea.vmem %s43_s14, 256  ;;  %p87_p6 = scmp.lt.s32.totalorder %s43_s14, %s43_s14 }
  0x11   :  { %27 = vadd.xlane.f32.xlu0 %v25_v2  ;;  %p83_p5 = scmp.ne.s32.totalorder %s43_s14, %s82_s0  ;;  %p88_p7 = scmp.lt.s32.totalorder %s82_s0, %s82_s0 }
  0x13   :  { %p89_p8 = por %p88_p7, %p87_p6 }
  0x15   :  { %29 = vadd.xlane.f32.xlu0 %v26_v3  ;;  %p90_p9 = pnand %p89_p8, %p83_p5 }
  0x9a   :  { %v28_v4 = vpop.xlane.xlu0 %27 }
  0x9b   :  { %58 = vrsqrt.f32 %v28_v4 }
  0x9e   :  { %v30_v5 = vpop.xlane.xlu0 %29 }
  0x9f   :  { %60 = vrsqrt.f32 %v30_v5 }
  0xa8   :  { %v59_v6 = vpop.eup %58 }
  0xa9   :  { %v33_v7 = vmul.f32 %v59_v6, %v23_v0 }
  0xab   :  { %35 = vst [vmem:[#allocation5] sm:$0xff] %v33_v7 }
  0xac   :  { %v61_v8 = vpop.eup %60 }
  0xad   :  { %v34_v9 = vmul.f32 %v61_v8, %v24_v1 }
  0xaf   :  { %36 = vst [vmem:[#allocation5 + $0x8] sm:$0xff] %v34_v9 }
  0xb0   :  { %93 = shalt.err (!%p90_p9)
}
  0xb1   :  { %48 = dma.vmem_to_hbm [thread:$0]  %s43_s14, 256, %s133_s1, [#allocation4], %s107_s9, %s107_s9, %s108_s10  }
  0xb2   :  { %104 = dma.done.wait [#allocation4], 256  }
  0xb3   :  { %105 = vsyncadd [#allocation4], 4294967040 }
  0xb4   :  { %52 = vsyncpa [#allocation3], 1 }
  0xb5   :  { %53 = vsyncpa [#allocation4], 1 }

</bundles_post_ra>
